<compile_context>
chip_gen: v5e
topology: v5e:2x2
jax: 0.10.0
libtpu: 0.0.40
codegen_flags: <defaults>
</compile_context>

<pallas_src>
import functools

import jax
import jax.numpy as jnp
from jax.experimental import pallas as pl
from jax.experimental.pallas import tpu as pltpu

# torchbox defines EPS as float32 machine epsilon
EPS = 1.1920929e-07

_LANES = 128
_TARGET_BLOCK_ROWS = 2048   # 2048 * 128 * 4 B = 1 MiB per input tile
_NUM_SPLITS = 2             # leading "parallel" axis (2 TensorCores on v7x)


def _cdiv(a, b):
    return -(-a // b)


def _jaccard_kernel(p_ref, g_ref, out_ref, *,
                    tiles_per_split, block_rows, rows, needs_mask):
    c = pl.program_id(0)   # core-split index ("parallel")
    k = pl.program_id(1)   # reduction step    ("arbitrary")

    @pl.when(k == 0)
    def _():
        out_ref[...] = jnp.zeros_like(out_ref)

    p = p_ref[...]
    g = g_ref[...]

    if needs_mask:
        # Zero rows past the end of the (rows, 128) array: covers the partial
        # last tile and the fully-clamped duplicate tiles of the second split
        # when the tile count is not a multiple of _NUM_SPLITS.
        row0 = (c * tiles_per_split + k) * block_rows
        local = jax.lax.broadcasted_iota(jnp.int32, (block_rows, _LANES), 0)
        valid = (row0 + local) < rows
        zero = jnp.zeros_like(p)
        p = jnp.where(valid, p, zero)
        g = jnp.where(valid, g, zero)

    # Per-lane partial sums, accumulated in the VMEM-resident output block.
    out_ref[0, 0] += jnp.sum(p * g, axis=0, keepdims=True)   # cap partials
    out_ref[0, 1] += jnp.sum(p + g, axis=0, keepdims=True)   # cup partials


def jaccard(P, G):
    """Jaccard distance of two same-shaped tensors (any rank), scalar output."""
    assert P.shape == G.shape
    p_flat = jnp.ravel(P).astype(jnp.float32)
    g_flat = jnp.ravel(G).astype(jnp.float32)
    n = p_flat.shape[0]

    # Lane alignment: only pads (and therefore copies) in the rare case where
    # numel % 128 != 0; zero padding is sum-neutral for both cap and cup.
    rem = n % _LANES
    if rem:
        p_flat = jnp.pad(p_flat, (0, _LANES - rem))
        g_flat = jnp.pad(g_flat, (0, _LANES - rem))

    rows = p_flat.shape[0] // _LANES
    p2d = p_flat.reshape(rows, _LANES)
    g2d = g_flat.reshape(rows, _LANES)

    block_rows = min(_TARGET_BLOCK_ROWS, rows)   # 2048 is 8-aligned; else full extent
    num_tiles = _cdiv(rows, block_rows)
    tiles_per_split = _cdiv(num_tiles, _NUM_SPLITS)
    needs_mask = (_NUM_SPLITS * tiles_per_split * block_rows) != rows

    def in_index(c, k):
        # Clamp so out-of-range tiles of the last split re-read a valid tile;
        # their contribution is zeroed by the row mask in the kernel.
        return (jnp.minimum(c * tiles_per_split + k, num_tiles - 1), 0)

    kernel = functools.partial(
        _jaccard_kernel,
        tiles_per_split=tiles_per_split,
        block_rows=block_rows,
        rows=rows,
        needs_mask=needs_mask,
    )

    out = pl.pallas_call(
        kernel,
        out_shape=jax.ShapeDtypeStruct((_NUM_SPLITS, 2, 1, _LANES), jnp.float32),
        grid_spec=pltpu.PrefetchScalarGridSpec(
            num_scalar_prefetch=0,
            grid=(_NUM_SPLITS, tiles_per_split),
            in_specs=[
                pl.BlockSpec((block_rows, _LANES), in_index),
                pl.BlockSpec((block_rows, _LANES), in_index),
            ],
            out_specs=pl.BlockSpec((1, 2, 1, _LANES), lambda c, k: (c, 0, 0, 0)),
        ),
        compiler_params=pltpu.CompilerParams(
            dimension_semantics=("parallel", "arbitrary"),
        ),
    )(p2d, g2d)

    cap = jnp.sum(out[:, 0])
    cup = jnp.sum(out[:, 1])
    return cap / (cup - cap + jnp.float32(EPS))


def jaccard_ref(P, G):
    cap = jnp.sum(P * G)
    cup = jnp.sum(P + G)
    return cap / (cup - cap + EPS)


if __name__ == "__main__":
    key = jax.random.PRNGKey(0)
    kp, kg = jax.random.split(key)

    # small NCHW-like inputs; values in [0, 1] as typical prediction / ground-truth masks
    P = jax.random.uniform(kp, (2, 4, 16, 16), dtype=jnp.float32)
    G = (jax.random.uniform(kg, (2, 4, 16, 16), dtype=jnp.float32) > 0.5).astype(jnp.float32)

    result = jax.block_until_ready(jaccard(P, G))
    expected = jaccard_ref(P, G)

    assert jnp.allclose(result, expected, rtol=1e-5, atol=1e-6), (result, expected)
    print("KERNEL_OK")
</pallas_src>

<mosaic_0001>
module attributes {stable_mosaic.version = 11 : i64} {
  func.func @_jaccard_kernel(%arg0: i32, %arg1: i32, %arg2: memref<16x128xf32, #tpu.memory_space<vmem>>, %arg3: memref<16x128xf32, #tpu.memory_space<vmem>>, %arg4: memref<1x2x1x128xf32, #tpu.memory_space<vmem>>) attributes {dimension_semantics = [#tpu.dimension_semantics<parallel>, #tpu.dimension_semantics<arbitrary>], iteration_bounds = array<i64: 2, 1>, scalar_prefetch = 0 : i64, scratch_operands = 0 : i64, tpu.core_type = #tpu.core_type<tc>, window_params = [{transform_indices = @transform_0, window_bounds = array<i64: 16, 128>}, {transform_indices = @transform_1, window_bounds = array<i64: 16, 128>}, {transform_indices = @transform_2, window_bounds = array<i64: 1, 2, 1, 128>}]} {
    %c0_i32 = arith.constant 0 : i32
    %0 = arith.cmpi eq, %arg1, %c0_i32 : i32
    %1 = arith.extui %0 : i1 to i32
    %c0_i32_0 = arith.constant 0 : i32
    %2 = arith.cmpi ne, %1, %c0_i32_0 : i32
    scf.if %2 {
      %cst_22 = arith.constant 0.000000e+00 : f32
      %34 = vector.broadcast %cst_22 : f32 to vector<1x2x1x128xf32>
      %c0_23 = arith.constant 0 : index
      %c0_24 = arith.constant 0 : index
      %c0_25 = arith.constant 0 : index
      %c0_26 = arith.constant 0 : index
      %35 = vector.load %arg4[%c0_23, %c0_24, %c0_25, %c0_26] : memref<1x2x1x128xf32, #tpu.memory_space<vmem>>, vector<1x2x1x128xf32>
      tpu.vector_store %arg4[%c0_23, %c0_24, %c0_25, %c0_26], %34 {strides = array<i32>} : memref<1x2x1x128xf32, #tpu.memory_space<vmem>>, vector<1x2x1x128xf32>,
    } else {
    }
    %c0 = arith.constant 0 : index
    %c0_1 = arith.constant 0 : index
    %3 = vector.load %arg2[%c0, %c0_1] : memref<16x128xf32, #tpu.memory_space<vmem>>, vector<16x128xf32>
    %c0_2 = arith.constant 0 : index
    %c0_3 = arith.constant 0 : index
    %4 = vector.load %arg3[%c0_2, %c0_3] : memref<16x128xf32, #tpu.memory_space<vmem>>, vector<16x128xf32>
    %c1_i32 = arith.constant 1 : i32
    %5 = arith.muli %arg0, %c1_i32 : i32
    %6 = arith.addi %5, %arg1 : i32
    %c16_i32 = arith.constant 16 : i32
    %7 = arith.muli %6, %c16_i32 : i32
    %8 = tpu.iota {dimensions = array<i32: 0>} : vector<16x128xi32>
    %9 = vector.broadcast %7 : i32 to vector<16x128xi32>
    %10 = arith.addi %9, %8 : vector<16x128xi32>
    %c16_i32_4 = arith.constant 16 : i32
    %11 = vector.broadcast %c16_i32_4 : i32 to vector<16x128xi32>
    %12 = arith.cmpi slt, %10, %11 : vector<16x128xi32>
    %cst = arith.constant 0.000000e+00 : f32
    %13 = vector.broadcast %cst : f32 to vector<16x128xf32>
    %14 = arith.select %12, %3, %13 : vector<16x128xi1>, vector<16x128xf32>
    %15 = arith.select %12, %4, %13 : vector<16x128xi1>, vector<16x128xf32>
    %c0_5 = arith.constant 0 : index
    %c0_6 = arith.constant 0 : index
    %c0_7 = arith.constant 0 : index
    %c0_8 = arith.constant 0 : index
    %16 = vector.load %arg4[%c0_5, %c0_6, %c0_7, %c0_8] : memref<1x2x1x128xf32, #tpu.memory_space<vmem>>, vector<1x1x1x128xf32>
    %17 = vector.shape_cast %16 : vector<1x1x1x128xf32> to vector<1x128xf32>
    %18 = arith.mulf %14, %15 : vector<16x128xf32>
    %cst_9 = arith.constant dense<0.000000e+00> : vector<128xf32>
    %19 = vector.multi_reduction <add>, %18, %cst_9 [0] : vector<16x128xf32> to vector<128xf32>
    %20 = vector.shape_cast %19 : vector<128xf32> to vector<1x128xf32>
    %21 = arith.addf %17, %20 : vector<1x128xf32>
    %c0_10 = arith.constant 0 : index
    %c0_11 = arith.constant 0 : index
    %c0_12 = arith.constant 0 : index
    %c0_13 = arith.constant 0 : index
    %22 = vector.load %arg4[%c0_10, %c0_11, %c0_12, %c0_13] : memref<1x2x1x128xf32, #tpu.memory_space<vmem>>, vector<1x1x1x128xf32>
    %23 = vector.shape_cast %22 : vector<1x1x1x128xf32> to vector<1x128xf32>
    %24 = vector.shape_cast %21 : vector<1x128xf32> to vector<1x1x1x128xf32>
    tpu.vector_store %arg4[%c0_10, %c0_11, %c0_12, %c0_13], %24 {strides = array<i32>} : memref<1x2x1x128xf32, #tpu.memory_space<vmem>>, vector<1x1x1x128xf32>,
    %c0_14 = arith.constant 0 : index
    %c1 = arith.constant 1 : index
    %c0_15 = arith.constant 0 : index
    %c0_16 = arith.constant 0 : index
    %25 = vector.load %arg4[%c0_14, %c1, %c0_15, %c0_16] : memref<1x2x1x128xf32, #tpu.memory_space<vmem>>, vector<1x1x1x128xf32>
    %26 = vector.shape_cast %25 : vector<1x1x1x128xf32> to vector<1x128xf32>
    %27 = arith.addf %14, %15 : vector<16x128xf32>
    %cst_17 = arith.constant dense<0.000000e+00> : vector<128xf32>
    %28 = vector.multi_reduction <add>, %27, %cst_17 [0] : vector<16x128xf32> to vector<128xf32>
    %29 = vector.shape_cast %28 : vector<128xf32> to vector<1x128xf32>
    %30 = arith.addf %26, %29 : vector<1x128xf32>
    %c0_18 = arith.constant 0 : index
    %c1_19 = arith.constant 1 : index
    %c0_20 = arith.constant 0 : index
    %c0_21 = arith.constant 0 : index
    %31 = vector.load %arg4[%c0_18, %c1_19, %c0_20, %c0_21] : memref<1x2x1x128xf32, #tpu.memory_space<vmem>>, vector<1x1x1x128xf32>
    %32 = vector.shape_cast %31 : vector<1x1x1x128xf32> to vector<1x128xf32>
    %33 = vector.shape_cast %30 : vector<1x128xf32> to vector<1x1x1x128xf32>
    tpu.vector_store %arg4[%c0_18, %c1_19, %c0_20, %c0_21], %33 {strides = array<i32>} : memref<1x2x1x128xf32, #tpu.memory_space<vmem>>, vector<1x1x1x128xf32>,
    return
  }
  func.func @transform_0(%arg0: i32, %arg1: i32) -> (i32, i32) {
    %c1_i32 = arith.constant 1 : i32
    %0 = arith.muli %arg0, %c1_i32 : i32
    %1 = arith.addi %0, %arg1 : i32
    %c0_i32 = arith.constant 0 : i32
    %2 = arith.minsi %1, %c0_i32 : i32
    %c0_i32_0 = arith.constant 0 : i32
    %c0_i32_1 = arith.constant 0 : i32
    return %2, %c0_i32_0 : i32, i32
  }
  func.func @transform_1(%arg0: i32, %arg1: i32) -> (i32, i32) {
    %c1_i32 = arith.constant 1 : i32
    %0 = arith.muli %arg0, %c1_i32 : i32
    %1 = arith.addi %0, %arg1 : i32
    %c0_i32 = arith.constant 0 : i32
    %2 = arith.minsi %1, %c0_i32 : i32
    %c0_i32_0 = arith.constant 0 : i32
    %c0_i32_1 = arith.constant 0 : i32
    return %2, %c0_i32_0 : i32, i32
  }
  func.func @transform_2(%arg0: i32, %arg1: i32) -> (i32, i32, i32, i32) {
    %c0_i32 = arith.constant 0 : i32
    %c0_i32_0 = arith.constant 0 : i32
    %c0_i32_1 = arith.constant 0 : i32
    %c0_i32_2 = arith.constant 0 : i32
    return %arg0, %c0_i32, %c0_i32_0, %c0_i32_1 : i32, i32, i32, i32
  }
}

</mosaic_0001>

<bundles_post_ra>
// kernel: tpu_custom_call.1
= control target key start
LH: loop header
LB: loop body
LE: loop exit
PB: predicated region body
PF: predicated region fallthrough
CT: control target
= control target key end

     0   :  { %7 = vsyncpa [#allocation3], 0  ;;  %s904_s0 = inlined_call_operand.hbm [shape: f32[16,128], index: 0, kind: input, shape index: {}]   ;;  %s905_s1 = inlined_call_operand.hbm [shape: f32[16,128], index: 1, kind: input, shape index: {}]   ;;  %s906_s2 = inlined_call_operand.hbm [shape: f32[2,2,1,128], index: 2, kind: output, shape index: {}]  }
   0x1   :  { %9 = vsyncpa [#allocation3 + $0x1], 0 }
   0x2   :  { %10 = vsyncpa [#allocation6], 0 }
   0x3   :  { %12 = vsyncpa [#allocation6 + $0x1], 0 }
   0x4   :  { %13 = vsyncpa [#allocation4], 0 }
   0x5   :  { %15 = vsyncpa [#allocation4 + $0x1], 0  ;;  %s722_s9 = smov 0   ;;  %s724_s10 = smov 0  }
   0x6   :  { %s726_s11 = smov 0   ;;  %s728_s12 = smov 0  }
   0x7   :  { %s730_s13 = smov 0   ;;  %s732_s14 = smov 0  }
   0x8   :  { %s734_s15 = smov 0   ;;  %s736_s16 = smov 0  }
   0x9 LB: > { %s412_s17 = sadd.s32 4294967295, %s698_s16   ;;  %s413_s18 = sadd.s32 4294967294, %s698_s16   ;;  %s698_s16 = sphi %s736_s16, %s21_s16   ;;  %s694_s15 = sphi %s734_s15, %s918_s15   ;;  %s690_s14 = sphi %s732_s14, %s917_s14   ;;  %s686_s13 = sphi %s730_s13, %s894_s13   ;;  %s682_s12 = sphi %s728_s12, %s916_s12   ;;  %s678_s11 = sphi %s726_s11, %s915_s11   ;;  %s674_s10 = sphi %s724_s10, %s914_s10   ;;  %s670_s9 = sphi %s722_s9, %s913_s9  }
   0xa   : > { %s33_s19 = sadd.s32 1, %s694_s15  ;;  %p667_p1 = scmp.ne.s32.totalorder %s686_s13, 0 }
   0xb   : > { %p35_p0 = scmp.ge.s32.totalorder %s33_s19, 2  ;;  %p54_p2 = scmp.eq.s32.totalorder %s698_s16, 0 }
   0xc   : > { %p59_p3 = scmp.ne.s32.totalorder %s686_s13, %s682_s12  ;;  %p60_p5 = scmp.eq.s32.totalorder %s412_s17, 0 }
   0xd   : > { %s920_s19 = smov (%p35_p0, %s33_s19), 0  ;;  %p768_p4 = por %p667_p1, %p54_p2 }
   0xe   : > { %p772_p6 = por %p60_p5, %p59_p3  ;;  %s101_s22 = ssub.s32 %s694_s15, %s920_s19 }
   0xf   : > { %p102_p7 = scmp.eq.s32.totalorder %s101_s22, 0  ;;  %s104_s23 = sadd.s32 1, %s678_s11 }
  0x10   : > { %p114_p8 = scmp.ne.s32.totalorder %s678_s11, %s674_s10  ;;  %p115_p9 = scmp.eq.s32.totalorder %s412_s17, 1 }
  0x11   : > { %s780_s24 = scalar_select %p102_p7, %s678_s11, %s104_s23  }
  0x12   : > { %p120_p10 = scmp.ne.s32.totalorder %s674_s10, %s670_s9  ;;  %p121_p11 = scmp.eq.s32.totalorder %s413_s18, 1 }
  0x13   : > { %p786_p12 = por %p115_p9, %p114_p8  ;;  %p415_p13 = scmp.ge.s32.totalorder %s698_s16, 2 }
  0x14   : > { %p791_p0 = por %p121_p11, %p120_p10  ;;  %p452_p1 = scmp.lt.s32.totalorder %s698_s16, 2 }
  0x15   : > { %s154_s29 = sshll.u32 %s904_s0, 4  ;;  %s700_s30 = smov [#allocation2]   ;;  %s155_s29 = int_to_ptr.hbm [resolvable:$true] %s154_s29 }
  0x16   : > { %s156_s3 = sshll.u32 %s700_s30, 4  ;;  %p801_p2 = pnand %p452_p1, %p768_p4  ;;  %s157_s3 = int_to_ptr.vmem [resolvable:$true] %s156_s3 }
  0x17   : > { %p422_p3 = scmp.ge.s32.totalorder %s698_s16, 1  ;;  %p189_p5 = scmp.lt.s32.totalorder %s698_s16, 3 }
  0x18   : > { %s531_s5 = sshra.s32 %s155_s29, 4  ;;  %p535_p8 = pneg %p801_p2  ;;  %s532_s5 = int_to_ptr.hbm [resolvable:$true] %s531_s5 }
  0x19   : > { %s533_s6 = scalar_lea.hbm %s532_s5, 16  ;;  %s538_s12 = scalar_lea.hbm %s904_s0, 16 }
  0x1a   : > { %p534_p7 = scmp.ne.s32.totalorder %s532_s5, %s533_s6  ;;  %p540_p4 = scmp.lt.s32.totalorder %s538_s12, %s533_s6 }
  0x1c   : > { %p536_p9 = pnand %p535_p8, %p534_p7 }
  0x1e   : > { %p537_p10 = pneg %p536_p9 }
  0x20   : > { %p542_p11 = pnand %p540_p4, %p537_p10 }
  0x22   : > { %545 = shalt.err (!%p542_p11)
}
  0x23   : > { %s701_s17 = smov 128   ;;  %s702_s18 = smov 8  }
  0x24   : > { %444 = dma.hbm_to_vmem [thread:$0]  (!%p801_p2), %s155_s29, 256, %s157_s3, [#allocation3], %s701_s17, %s701_s17, %s702_s18  }
  0x25   : > { %p821_p1 = pnand %p422_p3, %p189_p5  ;;  %s179_s27 = sshll.u32 %s905_s1, 4  ;;  %s180_s27 = int_to_ptr.hbm [resolvable:$true] %s179_s27 }
  0x26   : > { %s703_s28 = smov [#allocation5]   ;;  %s561_s5 = sshra.s32 %s180_s27, 4  ;;  %s562_s5 = int_to_ptr.hbm [resolvable:$true] %s561_s5 }
  0x27   : > { %s181_s30 = sshll.u32 %s703_s28, 4  ;;  %s563_s6 = scalar_lea.hbm %s562_s5, 16  ;;  %s182_s30 = int_to_ptr.vmem [resolvable:$true] %s181_s30 }
  0x28   : > { %p564_p7 = scmp.ne.s32.totalorder %s562_s5, %s563_s6  ;;  %s568_s7 = scalar_lea.hbm %s905_s1, 16 }
  0x29   : > { %p570_p3 = scmp.lt.s32.totalorder %s568_s7, %s563_s6 }
  0x2a   : > { %p566_p9 = pnand %p564_p7, %p535_p8 }
  0x2c   : > { %p567_p10 = pneg %p566_p9 }
  0x2e   : > { %p572_p5 = pnand %p570_p3, %p567_p10 }
  0x30   : > { %575 = shalt.err (!%p572_p5)
}
  0x31   : > { %447 = dma.hbm_to_vmem [thread:$0]  (!%p801_p2), %s180_s27, 256, %s182_s30, [#allocation6], %s701_s17, %s701_s17, %s702_s18  }
  0x32   : > { %193 = sbr.rel (%p821_p1) target bundleno = 91 (0x5b), region = 28  ;;  %s195_s8 = sand.u32 (!%p821_p1), 1, %s686_s13  }
  0x33   : > { %s423_s12 = sshll.u32 (!%p821_p1), %s195_s8, 4  ;;  %s196_s22 = scalar_lea.sflag (!%p821_p1), [#allocation3], %s195_s8 }
  0x34   : > { %s199_s23 = scalar_lea.vmem (!%p821_p1), [#allocation2], %s423_s12 }
  0x37   : > { %656 = dma.done.wait (%p772_p6), %s196_s22, 256  }
  0x38   : > { %658 = vsyncadd (%p772_p6), %s196_s22, 4294967040  ;;  %s206_s28 = scalar_lea.sflag [#allocation6], %s195_s8  ;;  %s209_s5 = scalar_lea.vmem [#allocation5], %s423_s12 }
  0x39   : > { %660 = dma.done.wait (%p772_p6), %s206_s28, 256  }
  0x3a   : > { %662 = vsyncadd (%p772_p6), %s206_s28, 4294967040  ;;  %s233_s4 = sand.u32 1, %s674_s10   ;;  %s426_s17 = sshll.u32 %s690_s14, 4  ;;  %v256_v0 = vlaneseq  ;;  %v704_v3 = vmov 0.0   ;;  %v250_v7 = vld [vmem:[%s199_s23] sm:$0xff]  ;;  %v251_v8 = vld [vmem:[%s199_s23 + $0x8] sm:$0xff] }
  0x3b   : > { %s425_s18 = sshll.u32 %s233_s4, 1  ;;  %v259_v1 = vstv %s426_s17  ;;  %v252_v9 = vld [vmem:[%s209_s5] sm:$0xff]  ;;  %v253_v10 = vld [vmem:[%s209_s5 + $0x8] sm:$0xff]  ;;  %s430_s21 = sshll.u32 %s690_s14, 1 }
  0x3c   : > { %v257_v2 = vshrl.u32 %v256_v0, 7  ;;  %s851_s20 = scalar_lea.vmem [#allocation7], %s425_s18  ;;  %s304_s6 = scalar_lea.hbm %s906_s2, %s430_s21 }
  0x3d   : > { %248 = vst [vmem:[%s851_s20] sm:$0x1] %v704_v3  ;;  %s305_s29 = sshll.u32 %s851_s20, 4  ;;  %s307_s3 = sshll.u32 %s304_s6, 4  ;;  %s306_s29 = int_to_ptr.vmem [resolvable:$true] %s305_s29  ;;  %s308_s3 = int_to_ptr.hbm [resolvable:$true] %s307_s3 }
  0x3e   : > { %249 = vst [vmem:[%s851_s20 + $0x1] sm:$0x1] %v704_v3  ;;  %v258_v4 = vadd.s32 8, %v257_v2  ;;  %v260_v5 = vadd.s32 %v259_v1, %v257_v2  ;;  %s294_s14 = scalar_lea.sflag [#allocation4], %s233_s4  ;;  %s605_s7 = sshra.s32 %s308_s3, 4  ;;  %s606_s7 = int_to_ptr.hbm [resolvable:$true] %s605_s7 }
  0x3f   : > { %s607_s8 = scalar_lea.hbm %s606_s7, 2  ;;  %s611_s23 = scalar_lea.hbm %s906_s2, 4 }
  0x40   : > { %v261_v6 = vadd.s32 %v259_v1, %v258_v4  ;;  %vm262_vm0 = vcmp.lt.s32.totalorder %v260_v5, 16  ;;  %p608_p6 = scmp.ne.s32.totalorder %s606_s7, %s607_s8  ;;  %p612_p4 = scmp.lt.s32.totalorder %s606_s7, %s906_s2 }
  0x41   : > { %v264_v11 = vsel %vm262_vm0, %v250_v7, 0.0  ;;  %v266_v12 = vsel %vm262_vm0, %v252_v9, 0.0  ;;  %p613_p11 = scmp.lt.s32.totalorder %s611_s23, %s607_s8 }
  0x42   : > { %vm263_vm1 = vcmp.lt.s32.totalorder %v261_v6, 16  ;;  %v269_v15 = vmul.f32 %v266_v12, %v264_v11  ;;  %v282_v16 = vadd.f32 %v266_v12, %v264_v11  ;;  %p609_p2 = pnand %p608_p6, %p786_p12 }
  0x43   : > { %v265_v13 = vsel %vm263_vm1, %v251_v8, 0.0  ;;  %v267_v14 = vsel %vm263_vm1, %v253_v10, 0.0  ;;  %p614_p1 = por %p613_p11, %p612_p4 }
  0x44   : > { %v270_v17 = vmul.f32 %v267_v14, %v265_v13  ;;  %v283_v18 = vadd.f32 %v267_v14, %v265_v13  ;;  %v268_v31 = vld [vmem:[%s851_s20] sm:$0x1]  ;;  %p610_p8 = pneg %p609_p2 }
  0x45   : > { %v427_v32 = vld [vmem:[%s851_s20 + $0x1] sm:$0x1] }
  0x46   : > { %v271_v19 = vadd.f32 %v270_v17, %v269_v15  ;;  %v284_v20 = vadd.f32 %v283_v18, %v282_v16  ;;  %p615_p7 = pnand %p614_p1, %p610_p8 }
  0x48   : > { %v272_v21 = vrot.slane %v271_v19, 4  ;;  %v285_v22 = vrot.slane %v284_v20, 4 }
  0x4a   : > { %v273_v23 = vadd.f32 %v272_v21, %v271_v19  ;;  %v286_v24 = vadd.f32 %v285_v22, %v284_v20 }
  0x4c   : > { %v274_v25 = vrot.slane %v273_v23, 2  ;;  %v287_v26 = vrot.slane %v286_v24, 2 }
  0x4e   : > { %v275_v27 = vadd.f32 %v274_v25, %v273_v23  ;;  %v288_v28 = vadd.f32 %v287_v26, %v286_v24 }
  0x50   : > { %v276_v29 = vrot.slane %v275_v27, 1  ;;  %v289_v30 = vrot.slane %v288_v28, 1 }
  0x52   : > { %v277_v33 = vadd.f32 %v276_v29, %v275_v27  ;;  %v290_v34 = vadd.f32 %v289_v30, %v288_v28 }
  0x54   : > { %v278_v35 = vadd.f32 %v277_v33, %v268_v31  ;;  %v291_v36 = vadd.f32 %v427_v32, %v290_v34 }
  0x56   : > { %279 = vst [vmem:[%s851_s20] sm:$0x1] %v278_v35 }
  0x57   : > { %428 = vst [vmem:[%s851_s20 + $0x1] sm:$0x1] %v291_v36 }
  0x58   : > { %618 = shalt.err (!%p615_p7)
}
  0x59   : > { %s705_s4 = smov 16   ;;  %s706_s17 = smov 1  }
  0x5a   : > { %439 = dma.vmem_to_hbm [thread:$0]  (%p786_p12), %s306_s29, 32, %s308_s3, %s294_s14, %s705_s4, %s705_s4, %s706_s17  }
  0x5b PF: > { %s322_s18 = sand.u32 1, %s670_s9   ;;  %p449_p9 = pnand %p415_p13, %p791_p0 }
  0x5c   : > { %s323_s20 = scalar_lea.sflag [#allocation4], %s322_s18 }
  0x5d   : > { %p450_p10 = pneg %p449_p9 }
  0x5f   : > { %664 = dma.done.wait (%p450_p10), %s323_s20, 32  }
  0x60   : > { %666 = vsyncadd (%p450_p10), %s323_s20, 4294967264  ;;  %s21_s16 = sadd.s32 1, %s698_s16   ;;  %s913_s9 = smov %s674_s10 }
  0x61   : > { %p18_p3 = scmp.ge.s32.totalorder %s21_s16, 4   ;;  %s914_s10 = smov %s678_s11 }
  0x62   : > { %s915_s11 = smov %s780_s24  ;;  %s916_s12 = smov %s686_s13 }
  0x63   : > { %s894_s13 = smov 0   ;;  %s917_s14 = smov %s694_s15 }
  0x64   : > { %s918_s15 = smov %s920_s19  ;;  %20 = sbr.rel (!%p18_p3) target bundleno = 9 (0x9), region = 91 }
  0x69   :  { %329 = vsyncpa [#allocation3], 1 }
  0x6a   :  { %331 = vsyncpa [#allocation3 + $0x1], 1 }
  0x6b   :  { %332 = vsyncpa [#allocation6], 1 }
  0x6c   :  { %334 = vsyncpa [#allocation6 + $0x1], 1 }
  0x6d   :  { %335 = vsyncpa [#allocation4], 1 }
  0x6e   :  { %337 = vsyncpa [#allocation4 + $0x1], 1 }

</bundles_post_ra>
